<compile_context>
chip_gen: v5e
topology: v5e:2x2
jax: 0.10.0
libtpu: 0.0.40
codegen_flags: <defaults>
</compile_context>

<pallas_src>
import functools

import jax
import jax.numpy as jnp
from jax.experimental import pallas as pl
from jax.experimental.pallas import tpu as pltpu

EPS = 1e-5
_VMEM_LIMIT = 32 * 1024 * 1024   # explicit scoped-VMEM budget, safe on v5e/v6e/v7x


def _cparams():
    # Position tiles are fully independent -> "parallel" lets megacore / the two
    # v7x TensorCores split the grid.
    return pltpu.CompilerParams(
        dimension_semantics=("parallel",),
        vmem_limit_bytes=_VMEM_LIMIT)


def _pick_tile(P, target):
    """Largest row tile <= target that divides P (keeps blocks sublane-aligned)."""
    for t in (target, 1024, 512, 256, 128, 64, 32, 16, 8):
        if t <= P and P % t == 0:
            return t
    return P   # fall back to a single full block (always a legal block shape)


# ---------------------------------------------------------------------------
# Pallas kernels
# ---------------------------------------------------------------------------
def _pw_conv_bn_relu_kernel(x_ref, w_ref, s_ref, b_ref, o_ref):
    """o = relu((x @ w) * scale + bias)   (1x1 conv + folded BN + ReLU)."""
    y = jnp.dot(x_ref[...], w_ref[...], preferred_element_type=jnp.float32)
    y = y * s_ref[...] + b_ref[...]
    o_ref[...] = jnp.maximum(y, 0.0).astype(o_ref.dtype)


def _fused_tail_proj_kernel(p_ref, xs_ref, w2_ref, s2_ref, b2_ref,
                            w3_ref, s3_ref, b3_ref,
                            ws_ref, ss_ref, bs_ref, o_ref):
    """o = relu( bn3(conv3(relu(bn2(conv2(patches))))) + bn_s(conv_s(xs)) )."""
    y2 = jnp.dot(p_ref[...], w2_ref[...], preferred_element_type=jnp.float32)
    y2 = jnp.maximum(y2 * s2_ref[...] + b2_ref[...], 0.0).astype(w3_ref.dtype)
    y3 = jnp.dot(y2, w3_ref[...], preferred_element_type=jnp.float32)
    y3 = y3 * s3_ref[...] + b3_ref[...]
    sc = jnp.dot(xs_ref[...], ws_ref[...], preferred_element_type=jnp.float32)
    sc = sc * ss_ref[...] + bs_ref[...]
    o_ref[...] = jnp.maximum(y3 + sc, 0.0).astype(o_ref.dtype)


def _fused_tail_ident_kernel(p_ref, xs_ref, w2_ref, s2_ref, b2_ref,
                             w3_ref, s3_ref, b3_ref, o_ref):
    """o = relu( bn3(conv3(relu(bn2(conv2(patches))))) + xs )   (identity shortcut)."""
    y2 = jnp.dot(p_ref[...], w2_ref[...], preferred_element_type=jnp.float32)
    y2 = jnp.maximum(y2 * s2_ref[...] + b2_ref[...], 0.0).astype(w3_ref.dtype)
    y3 = jnp.dot(y2, w3_ref[...], preferred_element_type=jnp.float32)
    y3 = y3 * s3_ref[...] + b3_ref[...]
    o_ref[...] = jnp.maximum(y3 + xs_ref[...].astype(jnp.float32), 0.0).astype(o_ref.dtype)


# ---------------------------------------------------------------------------
# pallas_call wrappers (position-tiled grids)
# ---------------------------------------------------------------------------
def _row_spec(tp, c):
    return pl.BlockSpec((tp, c), lambda i: (i, 0))


def _full_spec(shape):
    return pl.BlockSpec(shape, lambda i: (0,) * len(shape))


def pw_conv_bn_relu(x_flat, w, scale, bias, *, out_dtype, tile_rows):
    P, Cin = x_flat.shape
    Cout = w.shape[1]
    tp = _pick_tile(P, tile_rows)
    return pl.pallas_call(
        _pw_conv_bn_relu_kernel,
        out_shape=jax.ShapeDtypeStruct((P, Cout), out_dtype),
        grid=(P // tp,),
        in_specs=[
            _row_spec(tp, Cin),
            _full_spec((Cin, Cout)),
            _full_spec((1, Cout)),
            _full_spec((1, Cout)),
        ],
        out_specs=_row_spec(tp, Cout),
        compiler_params=_cparams(),
    )(x_flat, w, scale.reshape(1, -1), bias.reshape(1, -1))


def fused_tail_projection(patches, xs, w2, s2, b2, w3, s3, b3, ws, ss, bs, *, tile_rows):
    P2, K2 = patches.shape
    Cin = xs.shape[1]
    Cb = w2.shape[1]
    Cout = w3.shape[1]
    tp = _pick_tile(P2, tile_rows)
    return pl.pallas_call(
        _fused_tail_proj_kernel,
        out_shape=jax.ShapeDtypeStruct((P2, Cout), jnp.float32),
        grid=(P2 // tp,),
        in_specs=[
            _row_spec(tp, K2),
            _row_spec(tp, Cin),
            _full_spec((K2, Cb)), _full_spec((1, Cb)), _full_spec((1, Cb)),
            _full_spec((Cb, Cout)), _full_spec((1, Cout)), _full_spec((1, Cout)),
            _full_spec((Cin, Cout)), _full_spec((1, Cout)), _full_spec((1, Cout)),
        ],
        out_specs=_row_spec(tp, Cout),
        compiler_params=_cparams(),
    )(patches, xs, w2, s2.reshape(1, -1), b2.reshape(1, -1),
      w3, s3.reshape(1, -1), b3.reshape(1, -1),
      ws, ss.reshape(1, -1), bs.reshape(1, -1))


def fused_tail_identity(patches, xs, w2, s2, b2, w3, s3, b3, *, tile_rows):
    P2, K2 = patches.shape
    Cb = w2.shape[1]
    Cout = w3.shape[1]
    tp = _pick_tile(P2, tile_rows)
    return pl.pallas_call(
        _fused_tail_ident_kernel,
        out_shape=jax.ShapeDtypeStruct((P2, Cout), jnp.float32),
        grid=(P2 // tp,),
        in_specs=[
            _row_spec(tp, K2),
            _row_spec(tp, Cout),
            _full_spec((K2, Cb)), _full_spec((1, Cb)), _full_spec((1, Cb)),
            _full_spec((Cb, Cout)), _full_spec((1, Cout)), _full_spec((1, Cout)),
        ],
        out_specs=_row_spec(tp, Cout),
        compiler_params=_cparams(),
    )(patches, xs, w2, s2.reshape(1, -1), b2.reshape(1, -1),
      w3, s3.reshape(1, -1), b3.reshape(1, -1))


# ---------------------------------------------------------------------------
# Glue (layout plumbing, BN folding, im2col) in plain JAX
# ---------------------------------------------------------------------------
def _fold_bn(gamma, beta, mean, var):
    scale = gamma / jnp.sqrt(var + EPS)
    bias = beta - mean * scale
    return scale.astype(jnp.float32), bias.astype(jnp.float32)


def _im2col(y_nhwc, stride):
    """3x3 / pad 1 / stride `stride` patches, lane-dense (P2, 9*C) layout."""
    N, H, W, C = y_nhwc.shape
    Hout = (H - 1) // stride + 1
    Wout = (W - 1) // stride + 1
    yp = jnp.pad(y_nhwc, ((0, 0), (1, 1), (1, 1), (0, 0)))
    cols = []
    for ky in range(3):
        for kx in range(3):
            cols.append(yp[:, ky:ky + (Hout - 1) * stride + 1:stride,
                           kx:kx + (Wout - 1) * stride + 1:stride, :])
    p = jnp.concatenate(cols, axis=-1)                  # (N, Ho, Wo, 9*C)
    return p.reshape(N * Hout * Wout, 9 * C), Hout, Wout


def _grouped_weight_block_diag(w, groups):
    """(Cb, Cb/G, 3, 3) OIHW grouped weight -> block-diagonal (9*Cb, Cb) matrix."""
    Cout, Cg_in, KH, KW = w.shape
    Cg_out = Cout // groups
    wg = w.reshape(groups, Cg_out, Cg_in, KH, KW).transpose(3, 4, 0, 2, 1)
    eye = jnp.eye(groups, dtype=w.dtype)
    bd = jnp.einsum("khgio,gG->khgiGo", wg, eye)        # zero off-diagonal blocks
    return bd.reshape(KH * KW * Cout, Cout)


@functools.partial(jax.jit,
                   static_argnames=("stride", "cardinality", "compute_dtype", "tile_rows"))
def bottleneck_forward(x_nchw, params, stride, cardinality,
                       compute_dtype=jnp.bfloat16, tile_rows=256):
    N, Cin, H, W = x_nchw.shape
    cd = compute_dtype
    Cb = params["w1"].shape[0]
    Cout = params["w3"].shape[0]

    x = jnp.transpose(x_nchw, (0, 2, 3, 1))                        # NHWC (f32)

    # ---- conv1 (1x1) + bn1 + relu : position-tiled kernel ----------------
    s1, b1 = _fold_bn(*params["bn1"])
    w1 = params["w1"][:, :, 0, 0].T.astype(cd)                     # (Cin, Cb)
    y1 = pw_conv_bn_relu(x.reshape(N * H * W, Cin).astype(cd), w1, s1, b1,
                         out_dtype=cd, tile_rows=tile_rows)
    y1 = y1.reshape(N, H, W, Cb)

    # ---- conv2 + bn2 + relu + conv3 + bn3 + shortcut + add + relu --------
    # TODO(synk): im2col still materializes a (P2, 9*Cb) tensor in HBM; fusing
    #             the patch extraction into the kernel via halo-row DMA would
    #             remove that traffic entirely.
    patches, Hout, Wout = _im2col(y1, stride)
    P2 = N * Hout * Wout

    # TODO(synk): the block-diagonal weight wastes G x MXU FLOPs for large
    #             cardinality; a packed-groups variant (several groups per
    #             128-lane block) would avoid that at ResNeXt scale.
    w2 = _grouped_weight_block_diag(params["w2"], cardinality).astype(cd)
    s2, b2 = _fold_bn(*params["bn2"])
    w3 = params["w3"][:, :, 0, 0].T.astype(cd)                     # (Cb, Cout)
    s3, b3 = _fold_bn(*params["bn3"])

    if "ws" in params:
        # Projection shortcut (strided 1x1 conv + BN), fused into the tail kernel.
        xs = x[:, ::stride, ::stride, :].reshape(P2, Cin).astype(cd)
        ws = params["ws"][:, :, 0, 0].T.astype(cd)                 # (Cin, Cout)
        ss, bs = _fold_bn(*params["bns"])
        out = fused_tail_projection(patches, xs, w2, s2, b2, w3, s3, b3,
                                    ws, ss, bs, tile_rows=tile_rows)
    else:
        # Identity shortcut: PyTorch only builds it when Cin == Cout, and a
        # valid block then needs stride == 1 for the residual shapes to match.
        assert stride == 1 and Cin == Cout
        xs = x.reshape(P2, Cin)                                    # f32, plain add in-kernel
        out = fused_tail_identity(patches, xs, w2, s2, b2, w3, s3, b3,
                                  tile_rows=tile_rows)

    return out.reshape(N, Hout, Wout, Cout).transpose(0, 3, 1, 2)  # back to NCHW


# ---------------------------------------------------------------------------
# Pure-JAX reference (mirrors the PyTorch forward, eval-mode BN)
# ---------------------------------------------------------------------------
def ref_forward(x, p, stride, cardinality):
    def conv(x, w, s, groups=1, pad=0):
        return jax.lax.conv_general_dilated(
            x, w, (s, s), [(pad, pad), (pad, pad)],
            dimension_numbers=("NCHW", "OIHW", "NCHW"),
            feature_group_count=groups)

    def bn(x, stats):
        gamma, beta, mean, var = stats
        sc = gamma / jnp.sqrt(var + EPS)
        b = beta - mean * sc
        return x * sc[None, :, None, None] + b[None, :, None, None]

    y = jax.nn.relu(bn(conv(x, p["w1"], 1), p["bn1"]))
    y = jax.nn.relu(bn(conv(y, p["w2"], stride, groups=cardinality, pad=1), p["bn2"]))
    y = bn(conv(y, p["w3"], 1), p["bn3"])
    if "ws" in p:
        sc = bn(conv(x, p["ws"], stride), p["bns"])
    else:
        sc = x
    return jax.nn.relu(y + sc)


# ---------------------------------------------------------------------------
# Deterministic parameter init (shapes per BottleneckBlock.__init__)
# ---------------------------------------------------------------------------
def init_params(key, in_channels, out_channels, stride, cardinality):
    expansion = 4
    Cb = cardinality * out_channels // expansion
    keys = jax.random.split(key, 16)

    def bn_stats(k, c):
        k1, k2, k3, k4 = jax.random.split(k, 4)
        gamma = jax.random.uniform(k1, (c,), jnp.float32, 0.5, 1.5)
        beta = 0.1 * jax.random.normal(k2, (c,), jnp.float32)
        mean = 0.1 * jax.random.normal(k3, (c,), jnp.float32)
        var = jax.random.uniform(k4, (c,), jnp.float32, 0.5, 1.5)
        return (gamma, beta, mean, var)

    p = {
        "w1": 0.2 * jax.random.normal(keys[0], (Cb, in_channels, 1, 1), jnp.float32),
        "bn1": bn_stats(keys[1], Cb),
        "w2": 0.2 * jax.random.normal(keys[2], (Cb, Cb // cardinality, 3, 3), jnp.float32),
        "bn2": bn_stats(keys[3], Cb),
        "w3": 0.2 * jax.random.normal(keys[4], (out_channels, Cb, 1, 1), jnp.float32),
        "bn3": bn_stats(keys[5], out_channels),
    }
    if in_channels != out_channels:
        p["ws"] = 0.2 * jax.random.normal(
            keys[6], (out_channels, in_channels, 1, 1), jnp.float32)
        p["bns"] = bn_stats(keys[7], out_channels)
    return p


if __name__ == "__main__":
    key = jax.random.PRNGKey(0)
    N, H, W = 2, 16, 16

    configs = [
        # projection shortcut (channels change, stride 2)
        dict(in_channels=8, out_channels=16, stride=2, cardinality=4),
        # identity shortcut (channels match, stride 1)
        dict(in_channels=16, out_channels=16, stride=1, cardinality=4),
    ]

    for cfg in configs:
        kx, kp, key = jax.random.split(key, 3)
        x = jax.random.normal(kx, (N, cfg["in_channels"], H, W), jnp.float32)
        params = init_params(kp, **cfg)

        ref = jax.block_until_ready(
            ref_forward(x, params, cfg["stride"], cfg["cardinality"]))

        # strict correctness check: f32 matmul path
        out_f32 = jax.block_until_ready(bottleneck_forward(
            x, params, stride=cfg["stride"], cardinality=cfg["cardinality"],
            compute_dtype=jnp.float32))
        assert out_f32.shape == ref.shape, (out_f32.shape, ref.shape)
        assert jnp.allclose(out_f32, ref, rtol=2e-3, atol=2e-3), \
            float(jnp.max(jnp.abs(out_f32 - ref)))

        # production config: bf16 MXU inputs / f32 accumulation (loose sanity check)
        out_bf16 = jax.block_until_ready(bottleneck_forward(
            x, params, stride=cfg["stride"], cardinality=cfg["cardinality"],
            compute_dtype=jnp.bfloat16))
        assert out_bf16.shape == ref.shape
        assert jnp.allclose(out_bf16, ref, rtol=1e-1, atol=1e-1), \
            float(jnp.max(jnp.abs(out_bf16 - ref)))

    print("KERNEL_OK")
</pallas_src>

<mosaic_0001>
module attributes {stable_mosaic.version = 11 : i64} {
  func.func @_pw_conv_bn_relu_kernel(%arg0: i32, %arg1: memref<256x8xf32, #tpu.memory_space<vmem>>, %arg2: memref<8x16xf32, #tpu.memory_space<vmem>>, %arg3: memref<1x16xf32, #tpu.memory_space<vmem>>, %arg4: memref<1x16xf32, #tpu.memory_space<vmem>>, %arg5: memref<256x16xf32, #tpu.memory_space<vmem>>) attributes {dimension_semantics = [#tpu.dimension_semantics<parallel>], iteration_bounds = array<i64: 2>, scalar_prefetch = 0 : i64, scratch_operands = 0 : i64, tpu.core_type = #tpu.core_type<tc>, window_params = [{transform_indices = @transform_0, window_bounds = array<i64: 256, 8>}, {pipeline_mode = #tpu.pipeline_mode<synchronous>, transform_indices = @transform_1, window_bounds = array<i64: 8, 16>}, {pipeline_mode = #tpu.pipeline_mode<synchronous>, transform_indices = @transform_2, window_bounds = array<i64: 1, 16>}, {pipeline_mode = #tpu.pipeline_mode<synchronous>, transform_indices = @transform_3, window_bounds = array<i64: 1, 16>}, {transform_indices = @transform_4, window_bounds = array<i64: 256, 16>}]} {
    %c0 = arith.constant 0 : index
    %c0_0 = arith.constant 0 : index
    %0 = vector.load %arg1[%c0, %c0_0] : memref<256x8xf32, #tpu.memory_space<vmem>>, vector<256x8xf32>
    %c0_1 = arith.constant 0 : index
    %c0_2 = arith.constant 0 : index
    %1 = vector.load %arg2[%c0_1, %c0_2] : memref<8x16xf32, #tpu.memory_space<vmem>>, vector<8x16xf32>
    %cst = arith.constant dense<0.000000e+00> : vector<256x16xf32>
    %2 = tpu.matmul %0, %1, %cst {dimension_numbers = #tpu.dot_dimension_numbers<[1], [0], [0], [1], [0, 0, 1, 1], [], []>} : vector<256x8xf32>, vector<8x16xf32>, vector<256x16xf32> -> vector<256x16xf32>
    %c0_3 = arith.constant 0 : index
    %c0_4 = arith.constant 0 : index
    %3 = vector.load %arg3[%c0_3, %c0_4] : memref<1x16xf32, #tpu.memory_space<vmem>>, vector<1x16xf32>
    %4 = vector.broadcast %3 : vector<1x16xf32> to vector<256x16xf32>
    %5 = arith.mulf %2, %4 : vector<256x16xf32>
    %c0_5 = arith.constant 0 : index
    %c0_6 = arith.constant 0 : index
    %6 = vector.load %arg4[%c0_5, %c0_6] : memref<1x16xf32, #tpu.memory_space<vmem>>, vector<1x16xf32>
    %7 = vector.broadcast %6 : vector<1x16xf32> to vector<256x16xf32>
    %8 = arith.addf %5, %7 : vector<256x16xf32>
    %cst_7 = arith.constant 0.000000e+00 : f32
    %9 = vector.broadcast %cst_7 : f32 to vector<256x16xf32>
    %10 = arith.maximumf %8, %9 : vector<256x16xf32>
    %c0_8 = arith.constant 0 : index
    %c0_9 = arith.constant 0 : index
    %11 = vector.load %arg5[%c0_8, %c0_9] : memref<256x16xf32, #tpu.memory_space<vmem>>, vector<256x16xf32>
    tpu.vector_store %arg5[%c0_8, %c0_9], %10 {strides = array<i32>} : memref<256x16xf32, #tpu.memory_space<vmem>>, vector<256x16xf32>,
    return
  }
  func.func @transform_0(%arg0: i32) -> (i32, i32) {
    %c0_i32 = arith.constant 0 : i32
    %c0_i32_0 = arith.constant 0 : i32
    return %arg0, %c0_i32 : i32, i32
  }
  func.func @transform_1(%arg0: i32) -> (i32, i32) {
    %c0_i32 = arith.constant 0 : i32
    %c0_i32_0 = arith.constant 0 : i32
    %c0_i32_1 = arith.constant 0 : i32
    return %c0_i32, %c0_i32_0 : i32, i32
  }
  func.func @transform_2(%arg0: i32) -> (i32, i32) {
    %c0_i32 = arith.constant 0 : i32
    %c0_i32_0 = arith.constant 0 : i32
    %c0_i32_1 = arith.constant 0 : i32
    return %c0_i32, %c0_i32_0 : i32, i32
  }
  func.func @transform_3(%arg0: i32) -> (i32, i32) {
    %c0_i32 = arith.constant 0 : i32
    %c0_i32_0 = arith.constant 0 : i32
    %c0_i32_1 = arith.constant 0 : i32
    return %c0_i32, %c0_i32_0 : i32, i32
  }
  func.func @transform_4(%arg0: i32) -> (i32, i32) {
    %c0_i32 = arith.constant 0 : i32
    %c0_i32_0 = arith.constant 0 : i32
    return %arg0, %c0_i32 : i32, i32
  }
}

module attributes {stable_mosaic.version = 11 : i64} {
  func.func @_fused_tail_proj_kernel(%arg0: i32, %arg1: memref<128x144xf32, #tpu.memory_space<vmem>>, %arg2: memref<128x8xf32, #tpu.memory_space<vmem>>, %arg3: memref<144x16xf32, #tpu.memory_space<vmem>>, %arg4: memref<1x16xf32, #tpu.memory_space<vmem>>, %arg5: memref<1x16xf32, #tpu.memory_space<vmem>>, %arg6: memref<16x16xf32, #tpu.memory_space<vmem>>, %arg7: memref<1x16xf32, #tpu.memory_space<vmem>>, %arg8: memref<1x16xf32, #tpu.memory_space<vmem>>, %arg9: memref<8x16xf32, #tpu.memory_space<vmem>>, %arg10: memref<1x16xf32, #tpu.memory_space<vmem>>, %arg11: memref<1x16xf32, #tpu.memory_space<vmem>>, %arg12: memref<128x16xf32, #tpu.memory_space<vmem>>) attributes {dimension_semantics = [#tpu.dimension_semantics<parallel>], iteration_bounds = array<i64: 1>, scalar_prefetch = 0 : i64, scratch_operands = 0 : i64, tpu.core_type = #tpu.core_type<tc>, window_params = [{transform_indices = @transform_0, window_bounds = array<i64: 128, 144>}, {transform_indices = @transform_1, window_bounds = array<i64: 128, 8>}, {pipeline_mode = #tpu.pipeline_mode<synchronous>, transform_indices = @transform_2, window_bounds = array<i64: 144, 16>}, {pipeline_mode = #tpu.pipeline_mode<synchronous>, transform_indices = @transform_3, window_bounds = array<i64: 1, 16>}, {pipeline_mode = #tpu.pipeline_mode<synchronous>, transform_indices = @transform_4, window_bounds = array<i64: 1, 16>}, {pipeline_mode = #tpu.pipeline_mode<synchronous>, transform_indices = @transform_5, window_bounds = array<i64: 16, 16>}, {pipeline_mode = #tpu.pipeline_mode<synchronous>, transform_indices = @transform_6, window_bounds = array<i64: 1, 16>}, {pipeline_mode = #tpu.pipeline_mode<synchronous>, transform_indices = @transform_7, window_bounds = array<i64: 1, 16>}, {pipeline_mode = #tpu.pipeline_mode<synchronous>, transform_indices = @transform_8, window_bounds = array<i64: 8, 16>}, {pipeline_mode = #tpu.pipeline_mode<synchronous>, transform_indices = @transform_9, window_bounds = array<i64: 1, 16>}, {pipeline_mode = #tpu.pipeline_mode<synchronous>, transform_indices = @transform_10, window_bounds = array<i64: 1, 16>}, {transform_indices = @transform_11, window_bounds = array<i64: 128, 16>}]} {
    %c0 = arith.constant 0 : index
    %c0_0 = arith.constant 0 : index
    %0 = vector.load %arg1[%c0, %c0_0] : memref<128x144xf32, #tpu.memory_space<vmem>>, vector<128x144xf32>
    %c0_1 = arith.constant 0 : index
    %c0_2 = arith.constant 0 : index
    %1 = vector.load %arg3[%c0_1, %c0_2] : memref<144x16xf32, #tpu.memory_space<vmem>>, vector<144x16xf32>
    %cst = arith.constant dense<0.000000e+00> : vector<128x16xf32>
    %2 = tpu.matmul %0, %1, %cst {dimension_numbers = #tpu.dot_dimension_numbers<[1], [0], [0], [1], [0, 0, 1, 1], [], []>} : vector<128x144xf32>, vector<144x16xf32>, vector<128x16xf32> -> vector<128x16xf32>
    %c0_3 = arith.constant 0 : index
    %c0_4 = arith.constant 0 : index
    %3 = vector.load %arg4[%c0_3, %c0_4] : memref<1x16xf32, #tpu.memory_space<vmem>>, vector<1x16xf32>
    %4 = vector.broadcast %3 : vector<1x16xf32> to vector<128x16xf32>
    %5 = arith.mulf %2, %4 : vector<128x16xf32>
    %c0_5 = arith.constant 0 : index
    %c0_6 = arith.constant 0 : index
    %6 = vector.load %arg5[%c0_5, %c0_6] : memref<1x16xf32, #tpu.memory_space<vmem>>, vector<1x16xf32>
    %7 = vector.broadcast %6 : vector<1x16xf32> to vector<128x16xf32>
    %8 = arith.addf %5, %7 : vector<128x16xf32>
    %cst_7 = arith.constant 0.000000e+00 : f32
    %9 = vector.broadcast %cst_7 : f32 to vector<128x16xf32>
    %10 = arith.maximumf %8, %9 : vector<128x16xf32>
    %c0_8 = arith.constant 0 : index
    %c0_9 = arith.constant 0 : index
    %11 = vector.load %arg6[%c0_8, %c0_9] : memref<16x16xf32, #tpu.memory_space<vmem>>, vector<16x16xf32>
    %cst_10 = arith.constant dense<0.000000e+00> : vector<128x16xf32>
    %12 = tpu.matmul %10, %11, %cst_10 {dimension_numbers = #tpu.dot_dimension_numbers<[1], [0], [0], [1], [0, 0, 1, 1], [], []>} : vector<128x16xf32>, vector<16x16xf32>, vector<128x16xf32> -> vector<128x16xf32>
    %c0_11 = arith.constant 0 : index
    %c0_12 = arith.constant 0 : index
    %13 = vector.load %arg7[%c0_11, %c0_12] : memref<1x16xf32, #tpu.memory_space<vmem>>, vector<1x16xf32>
    %14 = vector.broadcast %13 : vector<1x16xf32> to vector<128x16xf32>
    %15 = arith.mulf %12, %14 : vector<128x16xf32>
    %c0_13 = arith.constant 0 : index
    %c0_14 = arith.constant 0 : index
    %16 = vector.load %arg8[%c0_13, %c0_14] : memref<1x16xf32, #tpu.memory_space<vmem>>, vector<1x16xf32>
    %17 = vector.broadcast %16 : vector<1x16xf32> to vector<128x16xf32>
    %18 = arith.addf %15, %17 : vector<128x16xf32>
    %c0_15 = arith.constant 0 : index
    %c0_16 = arith.constant 0 : index
    %19 = vector.load %arg2[%c0_15, %c0_16] : memref<128x8xf32, #tpu.memory_space<vmem>>, vector<128x8xf32>
    %c0_17 = arith.constant 0 : index
    %c0_18 = arith.constant 0 : index
    %20 = vector.load %arg9[%c0_17, %c0_18] : memref<8x16xf32, #tpu.memory_space<vmem>>, vector<8x16xf32>
    %cst_19 = arith.constant dense<0.000000e+00> : vector<128x16xf32>
    %21 = tpu.matmul %19, %20, %cst_19 {dimension_numbers = #tpu.dot_dimension_numbers<[1], [0], [0], [1], [0, 0, 1, 1], [], []>} : vector<128x8xf32>, vector<8x16xf32>, vector<128x16xf32> -> vector<128x16xf32>
    %c0_20 = arith.constant 0 : index
    %c0_21 = arith.constant 0 : index
    %22 = vector.load %arg10[%c0_20, %c0_21] : memref<1x16xf32, #tpu.memory_space<vmem>>, vector<1x16xf32>
    %23 = vector.broadcast %22 : vector<1x16xf32> to vector<128x16xf32>
    %24 = arith.mulf %21, %23 : vector<128x16xf32>
    %c0_22 = arith.constant 0 : index
    %c0_23 = arith.constant 0 : index
    %25 = vector.load %arg11[%c0_22, %c0_23] : memref<1x16xf32, #tpu.memory_space<vmem>>, vector<1x16xf32>
    %26 = vector.broadcast %25 : vector<1x16xf32> to vector<128x16xf32>
    %27 = arith.addf %24, %26 : vector<128x16xf32>
    %28 = arith.addf %18, %27 : vector<128x16xf32>
    %cst_24 = arith.constant 0.000000e+00 : f32
    %29 = vector.broadcast %cst_24 : f32 to vector<128x16xf32>
    %30 = arith.maximumf %28, %29 : vector<128x16xf32>
    %c0_25 = arith.constant 0 : index
    %c0_26 = arith.constant 0 : index
    %31 = vector.load %arg12[%c0_25, %c0_26] : memref<128x16xf32, #tpu.memory_space<vmem>>, vector<128x16xf32>
    tpu.vector_store %arg12[%c0_25, %c0_26], %30 {strides = array<i32>} : memref<128x16xf32, #tpu.memory_space<vmem>>, vector<128x16xf32>,
    return
  }
  func.func @transform_0(%arg0: i32) -> (i32, i32) {
    %c0_i32 = arith.constant 0 : i32
    %c0_i32_0 = arith.constant 0 : i32
    return %arg0, %c0_i32 : i32, i32
  }
  func.func @transform_1(%arg0: i32) -> (i32, i32) {
    %c0_i32 = arith.constant 0 : i32
    %c0_i32_0 = arith.constant 0 : i32
    return %arg0, %c0_i32 : i32, i32
  }
  func.func @transform_2(%arg0: i32) -> (i32, i32) {
    %c0_i32 = arith.constant 0 : i32
    %c0_i32_0 = arith.constant 0 : i32
    %c0_i32_1 = arith.constant 0 : i32
    return %c0_i32, %c0_i32_0 : i32, i32
  }
  func.func @transform_3(%arg0: i32) -> (i32, i32) {
    %c0_i32 = arith.constant 0 : i32
    %c0_i32_0 = arith.constant 0 : i32
    %c0_i32_1 = arith.constant 0 : i32
    return %c0_i32, %c0_i32_0 : i32, i32
  }
  func.func @transform_4(%arg0: i32) -> (i32, i32) {
    %c0_i32 = arith.constant 0 : i32
    %c0_i32_0 = arith.constant 0 : i32
    %c0_i32_1 = arith.constant 0 : i32
    return %c0_i32, %c0_i32_0 : i32, i32
  }
  func.func @transform_5(%arg0: i32) -> (i32, i32) {
    %c0_i32 = arith.constant 0 : i32
    %c0_i32_0 = arith.constant 0 : i32
    %c0_i32_1 = arith.constant 0 : i32
    return %c0_i32, %c0_i32_0 : i32, i32
  }
  func.func @transform_6(%arg0: i32) -> (i32, i32) {
    %c0_i32 = arith.constant 0 : i32
    %c0_i32_0 = arith.constant 0 : i32
    %c0_i32_1 = arith.constant 0 : i32
    return %c0_i32, %c0_i32_0 : i32, i32
  }
  func.func @transform_7(%arg0: i32) -> (i32, i32) {
    %c0_i32 = arith.constant 0 : i32
    %c0_i32_0 = arith.constant 0 : i32
    %c0_i32_1 = arith.constant 0 : i32
    return %c0_i32, %c0_i32_0 : i32, i32
  }
  func.func @transform_8(%arg0: i32) -> (i32, i32) {
    %c0_i32 = arith.constant 0 : i32
    %c0_i32_0 = arith.constant 0 : i32
    %c0_i32_1 = arith.constant 0 : i32
    return %c0_i32, %c0_i32_0 : i32, i32
  }
  func.func @transform_9(%arg0: i32) -> (i32, i32) {
    %c0_i32 = arith.constant 0 : i32
    %c0_i32_0 = arith.constant 0 : i32
    %c0_i32_1 = arith.constant 0 : i32
    return %c0_i32, %c0_i32_0 : i32, i32
  }
  func.func @transform_10(%arg0: i32) -> (i32, i32) {
    %c0_i32 = arith.constant 0 : i32
    %c0_i32_0 = arith.constant 0 : i32
    %c0_i32_1 = arith.constant 0 : i32
    return %c0_i32, %c0_i32_0 : i32, i32
  }
  func.func @transform_11(%arg0: i32) -> (i32, i32) {
    %c0_i32 = arith.constant 0 : i32
    %c0_i32_0 = arith.constant 0 : i32
    return %arg0, %c0_i32 : i32, i32
  }
}

</mosaic_0001>

<bundles_post_ra>
// kernel: bottleneck_forward.2
= control target key start
LH: loop header
LB: loop body
LE: loop exit
PB: predicated region body
PF: predicated region fallthrough
CT: control target
= control target key end

     0   :  { %s726_s15 = smov 0   ;;  %s959_s0 = inlined_call_operand.vmem [shape: f32[512,8], index: 0, kind: input, shape index: {}]   ;;  %s960_s1 = inlined_call_operand.vmem [shape: f32[8,16], index: 1, kind: input, shape index: {}]   ;;  %s961_s2 = inlined_call_operand.vmem [shape: f32[1,16], index: 2, kind: input, shape index: {}]   ;;  %s962_s3 = inlined_call_operand.vmem [shape: f32[1,16], index: 3, kind: input, shape index: {}]   ;;  %s963_s4 = inlined_call_operand.vmem [shape: f32[512,16], index: 4, kind: output, shape index: {}]  }
   0x1 LB: > { %s637_s16 = sadd.s32 4294967295, %s699_s15   ;;  %p641_p0 = scmp.ge.s32.totalorder %s699_s15, 1  ;;  %s699_s15 = sphi %s726_s15, %s14_s15  }
   0x2   : > { %p163_p1 = scmp.lt.s32.totalorder %s699_s15, 3 }
   0x4   : > { %p164_p2 = pnand %p641_p0, %p163_p1 }
   0x5   : > { %s642_s19 = sshll.u32 (!%p164_p2), %s637_s16, 5 }
   0x6   : > { %167 = sbr.rel (%p164_p2) target bundleno = 211 (0xd3), region = 36  ;;  %p190_p3 = scmp.lt.s32.totalorder (!%p164_p2), %s642_s19, 63 }
   0xb   : > { %v233_v0 = vld [vmem:[%s960_s1] sm:$0xff]  ;;  %s965_s19 = smov (!%p190_p3, %s642_s19), 63  ;;  %vm234_vm0 = vcmask 64512   ;;  %vm548_vm1 = vcmask 130048  }
   0xc   : > { %681 = vmatpush.msra.mxu2 %v233_v0  ;;  %682 = vmatpush.msra.mxu3 %v233_v0  ;;  %s643_s20 = sshll.u32 %s965_s19, 3  ;;  %v814_v33 = vld [vmem:[%s961_s2] ss:$0 sm:$0xff] }
   0xd   : > { %346 = vmatpush.msra.mxu0 %v233_v0  ;;  %680 = vmatpush.msra.mxu1 %v233_v0  ;;  %s745_s23 = scalar_lea.vmem %s959_s0, %s643_s20  ;;  %v819_v34 = vld [vmem:[%s962_s3] ss:$0 sm:$0xff]  ;;  %s830_s30 = scalar_lea.vmem %s963_s4, %s643_s20 }
   0xe   : > { %v217_v1 = vld [vmem:[%s745_s23 + $0x80] sm:$0xff]  ;;  %v218_v5 = vld [vmem:[%s745_s23 + $0x88] sm:$0xff]  ;;  %v219_v9 = vld [vmem:[%s745_s23 + $0x90] sm:$0xff] }
   0xf   : > { %v225_v2 = vld [vmem:[%s745_s23 + $0xc0] sm:$0xff]  ;;  %662 = vmatmul.msk.f32.vlgmr.msra.gmra.mxu2 %vm234_vm0, %v217_v1  ;;  %v226_v6 = vld [vmem:[%s745_s23 + $0xc8] sm:$0xff]  ;;  %v227_v10 = vld [vmem:[%s745_s23 + $0xd0] sm:$0xff] }
  0x10   : > { %v201_v3 = vld [vmem:[%s745_s23] sm:$0xff]  ;;  %670 = vmatmul.msk.f32.vlgmr.msra.gmra.mxu3 %vm234_vm0, %v225_v2  ;;  %v202_v7 = vld [vmem:[%s745_s23 + $0x8] sm:$0xff]  ;;  %v203_v11 = vld [vmem:[%s745_s23 + $0x10] sm:$0xff] }
  0x11   : > { %v209_v4 = vld [vmem:[%s745_s23 + $0x40] sm:$0xff]  ;;  %646 = vmatmul.msk.f32.vlgmr.msra.gmra.mxu0 %vm234_vm0, %v201_v3  ;;  %v210_v8 = vld [vmem:[%s745_s23 + $0x48] sm:$0xff]  ;;  %v211_v12 = vld [vmem:[%s745_s23 + $0x50] sm:$0xff] }
  0x12   : > { %654 = vmatmul.msk.f32.vlgmr.msra.gmra.mxu1 %vm234_vm0, %v209_v4  ;;  %v220_v13 = vld [vmem:[%s745_s23 + $0x98] sm:$0xff]  ;;  %v221_v17 = vld [vmem:[%s745_s23 + $0xa0] sm:$0xff]  ;;  %v222_v21 = vld [vmem:[%s745_s23 + $0xa8] sm:$0xff] }
  0x13   : > { %v228_v14 = vld [vmem:[%s745_s23 + $0xd8] sm:$0xff]  ;;  %v229_v18 = vld [vmem:[%s745_s23 + $0xe0] sm:$0xff]  ;;  %v230_v22 = vld [vmem:[%s745_s23 + $0xe8] sm:$0xff] }
  0x14   : > { %v204_v15 = vld [vmem:[%s745_s23 + $0x18] sm:$0xff]  ;;  %v205_v19 = vld [vmem:[%s745_s23 + $0x20] sm:$0xff]  ;;  %v206_v23 = vld [vmem:[%s745_s23 + $0x28] sm:$0xff] }
  0x15   : > { %v212_v16 = vld [vmem:[%s745_s23 + $0x58] sm:$0xff]  ;;  %v213_v20 = vld [vmem:[%s745_s23 + $0x60] sm:$0xff]  ;;  %v214_v24 = vld [vmem:[%s745_s23 + $0x68] sm:$0xff] }
  0x16   : > { %v223_v25 = vld [vmem:[%s745_s23 + $0xb0] sm:$0xff]  ;;  %v224_v29 = vld [vmem:[%s745_s23 + $0xb8] sm:$0xff] }
  0x17   : > { %663 = vmatmul.msk.f32.gmra.mxu2 %vm234_vm0, %v218_v5  ;;  %v231_v26 = vld [vmem:[%s745_s23 + $0xf0] sm:$0xff]  ;;  %v232_v30 = vld [vmem:[%s745_s23 + $0xf8] sm:$0xff] }
  0x18   : > { %671 = vmatmul.msk.f32.gmra.mxu3 %vm234_vm0, %v226_v6  ;;  %v207_v27 = vld [vmem:[%s745_s23 + $0x30] sm:$0xff]  ;;  %v208_v31 = vld [vmem:[%s745_s23 + $0x38] sm:$0xff] }
  0x19   : > { %647 = vmatmul.msk.f32.gmra.mxu0 %vm234_vm0, %v202_v7  ;;  %v215_v28 = vld [vmem:[%s745_s23 + $0x70] sm:$0xff]  ;;  %v216_v32 = vld [vmem:[%s745_s23 + $0x78] sm:$0xff] }
  0x1a   : > { %655 = vmatmul.msk.f32.gmra.mxu1 %vm234_vm0, %v210_v8 }
  0x1f   : > { %664 = vmatmul.msk.f32.gmra.mxu2 %vm234_vm0, %v219_v9 }
  0x20   : > { %672 = vmatmul.msk.f32.gmra.mxu3 %vm234_vm0, %v227_v10 }
  0x21   : > { %648 = vmatmul.msk.f32.gmra.mxu0 %vm234_vm0, %v203_v11 }
  0x22   : > { %656 = vmatmul.msk.f32.gmra.mxu1 %vm234_vm0, %v211_v12 }
  0x27   : > { %665 = vmatmul.msk.f32.gmra.mxu2 %vm234_vm0, %v220_v13 }
  0x28   : > { %673 = vmatmul.msk.f32.gmra.mxu3 %vm234_vm0, %v228_v14 }
  0x29   : > { %649 = vmatmul.msk.f32.gmra.mxu0 %vm234_vm0, %v204_v15 }
  0x2a   : > { %657 = vmatmul.msk.f32.gmra.mxu1 %vm234_vm0, %v212_v16 }
  0x2f   : > { %666 = vmatmul.msk.f32.gmra.mxu2 %vm234_vm0, %v221_v17 }
  0x30   : > { %674 = vmatmul.msk.f32.gmra.mxu3 %vm234_vm0, %v229_v18 }
  0x31   : > { %650 = vmatmul.msk.f32.gmra.mxu0 %vm234_vm0, %v205_v19 }
  0x32   : > { %658 = vmatmul.msk.f32.gmra.mxu1 %vm234_vm0, %v213_v20 }
  0x37   : > { %667 = vmatmul.msk.f32.gmra.mxu2 %vm234_vm0, %v222_v21 }
  0x38   : > { %675 = vmatmul.msk.f32.gmra.mxu3 %vm234_vm0, %v230_v22 }
  0x39   : > { %651 = vmatmul.msk.f32.gmra.mxu0 %vm234_vm0, %v206_v23 }
  0x3a   : > { %659 = vmatmul.msk.f32.gmra.mxu1 %vm234_vm0, %v214_v24 }
  0x3f   : > { %668 = vmatmul.msk.f32.gmra.mxu2 %vm234_vm0, %v223_v25 }
  0x40   : > { %676 = vmatmul.msk.f32.gmra.mxu3 %vm234_vm0, %v231_v26 }
  0x41   : > { %652 = vmatmul.msk.f32.gmra.mxu0 %vm234_vm0, %v207_v27 }
  0x42   : > { %660 = vmatmul.msk.f32.gmra.mxu1 %vm234_vm0, %v215_v28 }
  0x47   : > { %669 = vmatmul.msk.f32.gmra.mxu2 %vm234_vm0, %v224_v29 }
  0x48   : > { %677 = vmatmul.msk.f32.gmra.mxu3 %vm234_vm0, %v232_v30 }
  0x49   : > { %653 = vmatmul.msk.f32.gmra.mxu0 %vm234_vm0, %v208_v31 }
  0x4a   : > { %661 = vmatmul.msk.f32.gmra.mxu1 %vm234_vm0, %v216_v32 }
  0x8e   : > { %v348_v35 = vpop.f32.mrf.mxu0 }
  0x8f   : > { %v372_v36 = vpop.f32.mrf.mxu1  ;;  %v448_v37 = vmul.f32 %v814_v33, %v348_v35 }
  0x90   : > { %v456_v38 = vmul.f32 %v814_v33, %v372_v36 }
  0x91   : > { %v484_v39 = vadd.f32 %v819_v34, %v448_v37 }
  0x92   : > { %v492_v40 = vadd.f32 %v819_v34, %v456_v38  ;;  %v396_v43 = vpop.f32.mrf.mxu2 }
  0x93   : > { %v516_v41 = vmax.f32 %v484_v39, 0.0  ;;  %v420_v44 = vpop.f32.mrf.mxu3  ;;  %v464_v45 = vmul.f32 %v814_v33, %v396_v43 }
  0x94   : > { %v524_v42 = vmax.f32 %v492_v40, 0.0  ;;  %v472_v46 = vmul.f32 %v814_v33, %v420_v44 }
  0x95   : > { %549 = vst.msk [vmem:[%s830_s30] sm:$0xff] %vm548_vm1, %v516_v41  ;;  %v500_v47 = vadd.f32 %v819_v34, %v464_v45 }
  0x96   : > { %557 = vst.msk [vmem:[%s830_s30 + $0x40] sm:$0xff] %vm548_vm1, %v524_v42  ;;  %v508_v48 = vadd.f32 %v819_v34, %v472_v46  ;;  %v351_v49 = vpop.f32.mrf.mxu0 }
  0x97   : > { %v375_v50 = vpop.f32.mrf.mxu1  ;;  %v449_v51 = vmul.f32 %v814_v33, %v351_v49  ;;  %v532_v53 = vmax.f32 %v500_v47, 0.0 }
  0x98   : > { %v457_v52 = vmul.f32 %v814_v33, %v375_v50  ;;  %v540_v54 = vmax.f32 %v508_v48, 0.0 }
  0x99   : > { %v485_v55 = vadd.f32 %v819_v34, %v449_v51  ;;  %565 = vst.msk [vmem:[%s830_s30 + $0x80] sm:$0xff] %vm548_vm1, %v532_v53 }
  0x9a   : > { %v493_v56 = vadd.f32 %v819_v34, %v457_v52  ;;  %573 = vst.msk [vmem:[%s830_s30 + $0xc0] sm:$0xff] %vm548_vm1, %v540_v54  ;;  %v399_v59 = vpop.f32.mrf.mxu2 }
  0x9b   : > { %v517_v57 = vmax.f32 %v485_v55, 0.0  ;;  %v423_v60 = vpop.f32.mrf.mxu3  ;;  %v465_v61 = vmul.f32 %v814_v33, %v399_v59 }
  0x9c   : > { %v525_v58 = vmax.f32 %v493_v56, 0.0  ;;  %v473_v62 = vmul.f32 %v814_v33, %v423_v60 }
  0x9d   : > { %550 = vst.msk [vmem:[%s830_s30 + $0x8] sm:$0xff] %vm548_vm1, %v517_v57  ;;  %v501_v63 = vadd.f32 %v819_v34, %v465_v61 }
  0x9e   : > { %558 = vst.msk [vmem:[%s830_s30 + $0x48] sm:$0xff] %vm548_vm1, %v525_v58  ;;  %v509_v0 = vadd.f32 %v819_v34, %v473_v62  ;;  %v354_v1 = vpop.f32.mrf.mxu0 }
  0x9f   : > { %v378_v2 = vpop.f32.mrf.mxu1  ;;  %v450_v3 = vmul.f32 %v814_v33, %v354_v1  ;;  %v533_v5 = vmax.f32 %v501_v63, 0.0 }
  0xa0   : > { %v458_v4 = vmul.f32 %v814_v33, %v378_v2  ;;  %v541_v6 = vmax.f32 %v509_v0, 0.0 }
  0xa1   : > { %v486_v7 = vadd.f32 %v819_v34, %v450_v3  ;;  %566 = vst.msk [vmem:[%s830_s30 + $0x88] sm:$0xff] %vm548_vm1, %v533_v5 }
  0xa2   : > { %v494_v8 = vadd.f32 %v819_v34, %v458_v4  ;;  %574 = vst.msk [vmem:[%s830_s30 + $0xc8] sm:$0xff] %vm548_vm1, %v541_v6  ;;  %v402_v11 = vpop.f32.mrf.mxu2 }
  0xa3   : > { %v518_v9 = vmax.f32 %v486_v7, 0.0  ;;  %v426_v12 = vpop.f32.mrf.mxu3  ;;  %v466_v13 = vmul.f32 %v814_v33, %v402_v11 }
  0xa4   : > { %v526_v10 = vmax.f32 %v494_v8, 0.0  ;;  %v474_v14 = vmul.f32 %v814_v33, %v426_v12 }
  0xa5   : > { %551 = vst.msk [vmem:[%s830_s30 + $0x10] sm:$0xff] %vm548_vm1, %v518_v9  ;;  %v502_v15 = vadd.f32 %v819_v34, %v466_v13 }
  0xa6   : > { %559 = vst.msk [vmem:[%s830_s30 + $0x50] sm:$0xff] %vm548_vm1, %v526_v10  ;;  %v510_v16 = vadd.f32 %v819_v34, %v474_v14  ;;  %v357_v17 = vpop.f32.mrf.mxu0 }
  0xa7   : > { %v381_v18 = vpop.f32.mrf.mxu1  ;;  %v451_v19 = vmul.f32 %v814_v33, %v357_v17  ;;  %v534_v21 = vmax.f32 %v502_v15, 0.0 }
  0xa8   : > { %v459_v20 = vmul.f32 %v814_v33, %v381_v18  ;;  %v542_v22 = vmax.f32 %v510_v16, 0.0 }
  0xa9   : > { %v487_v23 = vadd.f32 %v819_v34, %v451_v19  ;;  %567 = vst.msk [vmem:[%s830_s30 + $0x90] sm:$0xff] %vm548_vm1, %v534_v21 }
  0xaa   : > { %v495_v24 = vadd.f32 %v819_v34, %v459_v20  ;;  %575 = vst.msk [vmem:[%s830_s30 + $0xd0] sm:$0xff] %vm548_vm1, %v542_v22  ;;  %v405_v27 = vpop.f32.mrf.mxu2 }
  0xab   : > { %v519_v25 = vmax.f32 %v487_v23, 0.0  ;;  %v429_v28 = vpop.f32.mrf.mxu3  ;;  %v467_v29 = vmul.f32 %v814_v33, %v405_v27 }
  0xac   : > { %v527_v26 = vmax.f32 %v495_v24, 0.0  ;;  %v475_v30 = vmul.f32 %v814_v33, %v429_v28 }
  0xad   : > { %552 = vst.msk [vmem:[%s830_s30 + $0x18] sm:$0xff] %vm548_vm1, %v519_v25  ;;  %v503_v31 = vadd.f32 %v819_v34, %v467_v29 }
  0xae   : > { %560 = vst.msk [vmem:[%s830_s30 + $0x58] sm:$0xff] %vm548_vm1, %v527_v26  ;;  %v511_v32 = vadd.f32 %v819_v34, %v475_v30  ;;  %v360_v35 = vpop.f32.mrf.mxu0 }
  0xaf   : > { %v384_v36 = vpop.f32.mrf.mxu1  ;;  %v452_v37 = vmul.f32 %v814_v33, %v360_v35  ;;  %v535_v39 = vmax.f32 %v503_v31, 0.0 }
  0xb0   : > { %v460_v38 = vmul.f32 %v814_v33, %v384_v36  ;;  %v543_v40 = vmax.f32 %v511_v32, 0.0 }
  0xb1   : > { %v488_v41 = vadd.f32 %v819_v34, %v452_v37  ;;  %568 = vst.msk [vmem:[%s830_s30 + $0x98] sm:$0xff] %vm548_vm1, %v535_v39 }
  0xb2   : > { %v496_v42 = vadd.f32 %v819_v34, %v460_v38  ;;  %576 = vst.msk [vmem:[%s830_s30 + $0xd8] sm:$0xff] %vm548_vm1, %v543_v40  ;;  %v408_v45 = vpop.f32.mrf.mxu2 }
  0xb3   : > { %v520_v43 = vmax.f32 %v488_v41, 0.0  ;;  %v432_v46 = vpop.f32.mrf.mxu3  ;;  %v468_v47 = vmul.f32 %v814_v33, %v408_v45 }
  0xb4   : > { %v528_v44 = vmax.f32 %v496_v42, 0.0  ;;  %v476_v48 = vmul.f32 %v814_v33, %v432_v46 }
  0xb5   : > { %553 = vst.msk [vmem:[%s830_s30 + $0x20] sm:$0xff] %vm548_vm1, %v520_v43  ;;  %v504_v49 = vadd.f32 %v819_v34, %v468_v47 }
  0xb6   : > { %561 = vst.msk [vmem:[%s830_s30 + $0x60] sm:$0xff] %vm548_vm1, %v528_v44  ;;  %v512_v50 = vadd.f32 %v819_v34, %v476_v48  ;;  %v363_v51 = vpop.f32.mrf.mxu0 }
  0xb7   : > { %v387_v52 = vpop.f32.mrf.mxu1  ;;  %v453_v53 = vmul.f32 %v814_v33, %v363_v51  ;;  %v536_v55 = vmax.f32 %v504_v49, 0.0 }
  0xb8   : > { %v461_v54 = vmul.f32 %v814_v33, %v387_v52  ;;  %v544_v56 = vmax.f32 %v512_v50, 0.0 }
  0xb9   : > { %v489_v57 = vadd.f32 %v819_v34, %v453_v53  ;;  %569 = vst.msk [vmem:[%s830_s30 + $0xa0] sm:$0xff] %vm548_vm1, %v536_v55 }
  0xba   : > { %v497_v58 = vadd.f32 %v819_v34, %v461_v54  ;;  %577 = vst.msk [vmem:[%s830_s30 + $0xe0] sm:$0xff] %vm548_vm1, %v544_v56  ;;  %v411_v61 = vpop.f32.mrf.mxu2 }
  0xbb   : > { %v521_v59 = vmax.f32 %v489_v57, 0.0  ;;  %v435_v62 = vpop.f32.mrf.mxu3  ;;  %v469_v63 = vmul.f32 %v814_v33, %v411_v61 }
  0xbc   : > { %v529_v60 = vmax.f32 %v497_v58, 0.0  ;;  %v477_v0 = vmul.f32 %v814_v33, %v435_v62 }
  0xbd   : > { %554 = vst.msk [vmem:[%s830_s30 + $0x28] sm:$0xff] %vm548_vm1, %v521_v59  ;;  %v505_v1 = vadd.f32 %v819_v34, %v469_v63 }
  0xbe   : > { %562 = vst.msk [vmem:[%s830_s30 + $0x68] sm:$0xff] %vm548_vm1, %v529_v60  ;;  %v513_v2 = vadd.f32 %v819_v34, %v477_v0  ;;  %v366_v3 = vpop.f32.mrf.mxu0 }
  0xbf   : > { %v390_v4 = vpop.f32.mrf.mxu1  ;;  %v454_v5 = vmul.f32 %v814_v33, %v366_v3  ;;  %v537_v7 = vmax.f32 %v505_v1, 0.0 }
  0xc0   : > { %v462_v6 = vmul.f32 %v814_v33, %v390_v4  ;;  %v545_v8 = vmax.f32 %v513_v2, 0.0 }
  0xc1   : > { %v490_v9 = vadd.f32 %v819_v34, %v454_v5  ;;  %570 = vst.msk [vmem:[%s830_s30 + $0xa8] sm:$0xff] %vm548_vm1, %v537_v7 }
  0xc2   : > { %v498_v10 = vadd.f32 %v819_v34, %v462_v6  ;;  %578 = vst.msk [vmem:[%s830_s30 + $0xe8] sm:$0xff] %vm548_vm1, %v545_v8  ;;  %v414_v13 = vpop.f32.mrf.mxu2 }
  0xc3   : > { %v522_v11 = vmax.f32 %v490_v9, 0.0  ;;  %v438_v14 = vpop.f32.mrf.mxu3  ;;  %v470_v15 = vmul.f32 %v814_v33, %v414_v13 }
  0xc4   : > { %v530_v12 = vmax.f32 %v498_v10, 0.0  ;;  %v478_v16 = vmul.f32 %v814_v33, %v438_v14 }
  0xc5   : > { %555 = vst.msk [vmem:[%s830_s30 + $0x30] sm:$0xff] %vm548_vm1, %v522_v11  ;;  %v506_v17 = vadd.f32 %v819_v34, %v470_v15 }
  0xc6   : > { %563 = vst.msk [vmem:[%s830_s30 + $0x70] sm:$0xff] %vm548_vm1, %v530_v12  ;;  %v514_v18 = vadd.f32 %v819_v34, %v478_v16  ;;  %v369_v19 = vpop.f32.mrf.mxu0 }
  0xc7   : > { %v393_v20 = vpop.f32.mrf.mxu1  ;;  %v455_v21 = vmul.f32 %v814_v33, %v369_v19  ;;  %v538_v23 = vmax.f32 %v506_v17, 0.0 }
  0xc8   : > { %v463_v22 = vmul.f32 %v814_v33, %v393_v20  ;;  %v546_v24 = vmax.f32 %v514_v18, 0.0 }
  0xc9   : > { %v491_v25 = vadd.f32 %v819_v34, %v455_v21  ;;  %571 = vst.msk [vmem:[%s830_s30 + $0xb0] sm:$0xff] %vm548_vm1, %v538_v23 }
  0xca   : > { %v499_v26 = vadd.f32 %v819_v34, %v463_v22  ;;  %579 = vst.msk [vmem:[%s830_s30 + $0xf0] sm:$0xff] %vm548_vm1, %v546_v24  ;;  %v417_v29 = vpop.f32.mrf.mxu2 }
  0xcb   : > { %v523_v27 = vmax.f32 %v491_v25, 0.0  ;;  %v441_v30 = vpop.f32.mrf.mxu3  ;;  %v471_v31 = vmul.f32 %v814_v33, %v417_v29 }
  0xcc   : > { %v531_v28 = vmax.f32 %v499_v26, 0.0  ;;  %v479_v32 = vmul.f32 %v814_v33, %v441_v30 }
  0xcd   : > { %556 = vst.msk [vmem:[%s830_s30 + $0x38] sm:$0xff] %vm548_vm1, %v523_v27  ;;  %v507_v35 = vadd.f32 %v819_v34, %v471_v31 }
  0xce   : > { %564 = vst.msk [vmem:[%s830_s30 + $0x78] sm:$0xff] %vm548_vm1, %v531_v28  ;;  %v515_v36 = vadd.f32 %v819_v34, %v479_v32 }
  0xcf   : > { %v539_v37 = vmax.f32 %v507_v35, 0.0 }
  0xd0   : > { %v547_v38 = vmax.f32 %v515_v36, 0.0 }
  0xd1   : > { %572 = vst.msk [vmem:[%s830_s30 + $0xb8] sm:$0xff] %vm548_vm1, %v539_v37 }
  0xd2   : > { %580 = vst.msk [vmem:[%s830_s30 + $0xf8] sm:$0xff] %vm548_vm1, %v547_v38 }
  0xd3 PF: > { %s14_s15 = sadd.s32 1, %s699_s15  }
  0xd4   : > { %p11_p4 = scmp.ge.s32.totalorder %s14_s15, 4  }
  0xd6   :  { %13 = sbr.rel (!%p11_p4) target bundleno = 1 (0x1), region = 66 }

// kernel: bottleneck_forward.3
= control target key start
LH: loop header
LB: loop body
LE: loop exit
PB: predicated region body
PF: predicated region fallthrough
CT: control target
= control target key end

     0   :  { %vm89_vm0 = vcmask 130048   ;;  %s1262_s0 = inlined_call_operand.vmem [shape: f32[128,144], index: 0, kind: input, shape index: {}]   ;;  %s1263_s1 = inlined_call_operand.vmem [shape: f32[128,8], index: 1, kind: input, shape index: {}]   ;;  %s1264_s2 = inlined_call_operand.vmem [shape: f32[144,16], index: 2, kind: input, shape index: {}]   ;;  %s1265_s3 = inlined_call_operand.vmem [shape: f32[1,16], index: 3, kind: input, shape index: {}]   ;;  %s1266_s4 = inlined_call_operand.vmem [shape: f32[1,16], index: 4, kind: input, shape index: {}]   ;;  %s1267_s5 = inlined_call_operand.vmem [shape: f32[16,16], index: 5, kind: input, shape index: {}]   ;;  %s1268_s6 = inlined_call_operand.vmem [shape: f32[1,16], index: 6, kind: input, shape index: {}]   ;;  %s1269_s7 = inlined_call_operand.vmem [shape: f32[1,16], index: 7, kind: input, shape index: {}]   ;;  %s1270_s8 = inlined_call_operand.vmem [shape: f32[8,16], index: 8, kind: input, shape index: {}]   ;;  %s1271_s9 = inlined_call_operand.vmem [shape: f32[1,16], index: 9, kind: input, shape index: {}]   ;;  %s1272_s10 = inlined_call_operand.vmem [shape: f32[1,16], index: 10, kind: input, shape index: {}]   ;;  %s1273_s11 = inlined_call_operand.hbm [shape: f32[128,16], index: 11, kind: output, shape index: {}]  }
   0x1   :  { %v86_v0 = vld [vmem:[%s1264_s2 + $0x78] sm:$0xff]  ;;  %v85_v1 = vld [vmem:[%s1264_s2 + $0x70] sm:$0xff]  ;;  %v84_v2 = vld [vmem:[%s1264_s2 + $0x68] sm:$0xff] }
   0x2   :  { %138 = vmatpush.msra.mxu0 %v86_v0  ;;  %v83_v3 = vld [vmem:[%s1264_s2 + $0x60] sm:$0xff]  ;;  %v88_v4 = vld [vmem:[%s1264_s2 + $0x88] sm:$0xff]  ;;  %v82_v6 = vld [vmem:[%s1264_s2 + $0x58] sm:$0xff] }
   0x3   :  { %v87_v5 = vld [vmem:[%s1264_s2 + $0x80] sm:$0xff]  ;;  %217 = vmatpush.msra.mxu1 %v88_v4  ;;  %v40_v7 = vld [vmem:[%s1262_s0 + $0x8] sm:$0xff]  ;;  %v81_v8 = vld [vmem:[%s1264_s2 + $0x50] sm:$0xff] }
   0x4   :  { %139 = vmatpush.msra.mxu0 %v85_v1 }
   0x5   :  { %218 = vmatpush.msra.mxu1 %v87_v5 }
   0x6   :  { %140 = vmatpush.msra.mxu0 %v84_v2  ;;  %716 = vmatmul.msk.f32.vlgmr.msra.gmra.mxu1 %vm89_vm0, %v40_v7 }
   0x8   :  { %141 = vmatpush.msra.mxu0 %v83_v3 }
   0xa   :  { %142 = vmatpush.msra.mxu0 %v82_v6 }
   0xb   :  { %16 = vsyncpa [#allocation3], 0  ;;  %v80_v9 = vld [vmem:[%s1264_s2 + $0x48] sm:$0xff]  ;;  %v79_v10 = vld [vmem:[%s1264_s2 + $0x40] sm:$0xff]  ;;  %vm496_vm1 = vcmask 64512   ;;  %s704_s18 = sshll.u32 %s1273_s11, 4  ;;  %s705_s18 = int_to_ptr.hbm [resolvable:$true] %s704_s18 }
   0xc   :  { %143 = vmatpush.msra.mxu0 %v81_v8  ;;  %v78_v11 = vld [vmem:[%s1264_s2 + $0x38] sm:$0xff]  ;;  %v77_v13 = vld [vmem:[%s1264_s2 + $0x30] sm:$0xff]  ;;  %v76_v14 = vld [vmem:[%s1264_s2 + $0x28] sm:$0xff]  ;;  %s800_s19 = smov 128   ;;  %s801_s20 = smov 8  }
   0xd   :  { %v42_v12 = vld [vmem:[%s1262_s0 + $0x18] sm:$0xff]  ;;  %v75_v15 = vld [vmem:[%s1264_s2 + $0x20] sm:$0xff]  ;;  %v44_v17 = vld [vmem:[%s1262_s0 + $0x28] sm:$0xff] }
   0xe   :  { %144 = vmatpush.msra.mxu0 %v80_v9  ;;  %717 = vmatmul.msk.f32.gmra.mxu1 %vm89_vm0, %v42_v12  ;;  %v74_v16 = vld [vmem:[%s1264_s2 + $0x18] sm:$0xff]  ;;  %v73_v18 = vld [vmem:[%s1264_s2 + $0x10] sm:$0xff]  ;;  %v72_v19 = vld [vmem:[%s1264_s2 + $0x8] sm:$0xff] }
   0xf   :  { %v71_v20 = vld [vmem:[%s1264_s2] sm:$0xff]  ;;  %v46_v22 = vld [vmem:[%s1262_s0 + $0x38] sm:$0xff]  ;;  %v41_v23 = vld [vmem:[%s1262_s0 + $0x10] sm:$0xff] }
  0x10   :  { %145 = vmatpush.msra.mxu0 %v79_v10  ;;  %v39_v21 = vld [vmem:[%s1262_s0] sm:$0xff]  ;;  %v48_v24 = vld [vmem:[%s1262_s0 + $0x48] sm:$0xff]  ;;  %v50_v26 = vld [vmem:[%s1262_s0 + $0x58] sm:$0xff] }
  0x11   :  { %v43_v25 = vld [vmem:[%s1262_s0 + $0x20] sm:$0xff]  ;;  %v45_v27 = vld [vmem:[%s1262_s0 + $0x30] sm:$0xff]  ;;  %v52_v28 = vld [vmem:[%s1262_s0 + $0x68] sm:$0xff] }
  0x12   :  { %146 = vmatpush.msra.mxu0 %v78_v11  ;;  %v47_v29 = vld [vmem:[%s1262_s0 + $0x40] sm:$0xff]  ;;  %v54_v30 = vld [vmem:[%s1262_s0 + $0x78] sm:$0xff]  ;;  %v49_v31 = vld [vmem:[%s1262_s0 + $0x50] sm:$0xff] }
  0x13   :  { %v56_v32 = vld [vmem:[%s1262_s0 + $0x88] sm:$0xff]  ;;  %v51_v33 = vld [vmem:[%s1262_s0 + $0x60] sm:$0xff]  ;;  %v58_v34 = vld [vmem:[%s1262_s0 + $0x98] sm:$0xff] }
  0x14   :  { %147 = vmatpush.msra.mxu0 %v77_v13  ;;  %v53_v35 = vld [vmem:[%s1262_s0 + $0x70] sm:$0xff]  ;;  %v60_v36 = vld [vmem:[%s1262_s0 + $0xa8] sm:$0xff]  ;;  %v55_v37 = vld [vmem:[%s1262_s0 + $0x80] sm:$0xff] }
  0x15   :  { %v62_v38 = vld [vmem:[%s1262_s0 + $0xb8] sm:$0xff]  ;;  %v57_v39 = vld [vmem:[%s1262_s0 + $0x90] sm:$0xff]  ;;  %v64_v40 = vld [vmem:[%s1262_s0 + $0xc8] sm:$0xff] }
  0x16   :  { %148 = vmatpush.msra.mxu0 %v76_v14  ;;  %718 = vmatmul.msk.f32.gmra.mxu1 %vm89_vm0, %v44_v17  ;;  %v59_v41 = vld [vmem:[%s1262_s0 + $0xa0] sm:$0xff]  ;;  %v66_v42 = vld [vmem:[%s1262_s0 + $0xd8] sm:$0xff]  ;;  %v61_v43 = vld [vmem:[%s1262_s0 + $0xb0] sm:$0xff] }
  0x17   :  { %v68_v44 = vld [vmem:[%s1262_s0 + $0xe8] sm:$0xff]  ;;  %v63_v45 = vld [vmem:[%s1262_s0 + $0xc0] sm:$0xff]  ;;  %v70_v46 = vld [vmem:[%s1262_s0 + $0xf8] sm:$0xff] }
  0x18   :  { %149 = vmatpush.msra.mxu0 %v75_v15  ;;  %v325_v47 = vld [vmem:[%s1267_s5 + $0x8] sm:$0xff]  ;;  %v324_v48 = vld [vmem:[%s1267_s5] sm:$0xff]  ;;  %v65_v50 = vld [vmem:[%s1262_s0 + $0xd0] sm:$0xff] }
  0x19   :  { %388 = vmatpush.msra.mxu2 %v325_v47  ;;  %v495_v49 = vld [vmem:[%s1270_s8] sm:$0xff]  ;;  %v480_v54 = vld [vmem:[%s1263_s1 + $0x8] sm:$0xff]  ;;  %v69_v56 = vld [vmem:[%s1262_s0 + $0xf0] sm:$0xff] }
  0x1a   :  { %150 = vmatpush.msra.mxu0 %v74_v16  ;;  %560 = vmatpush.msra.mxu3 %v495_v49  ;;  %v479_v51 = vld [vmem:[%s1263_s1] sm:$0xff]  ;;  %v481_v57 = vld [vmem:[%s1263_s1 + $0x10] sm:$0xff]  ;;  %v482_v61 = vld [vmem:[%s1263_s1 + $0x18] sm:$0xff] }
  0x1b   :  { %389 = vmatpush.msra.mxu2 %v324_v48  ;;  %748 = vmatmul.msk.f32.vlgmr.msra.gmra.mxu3 %vm496_vm1, %v479_v51  ;;  %v67_v53 = vld [vmem:[%s1262_s0 + $0xe0] sm:$0xff]  ;;  %v484_v12 = vld [vmem:[%s1263_s1 + $0x28] sm:$0xff] }
  0x1c   :  { %151 = vmatpush.msra.mxu0 %v73_v18  ;;  %v1052_v59 = vld [vmem:[%s1265_s3] ss:$0 sm:$0xff] }
  0x1d   :  { %v1060_v63 = vld [vmem:[%s1266_s4] ss:$0 sm:$0xff] }
  0x1e   :  { %152 = vmatpush.msra.mxu0 %v72_v19  ;;  %719 = vmatmul.msk.f32.gmra.mxu1 %vm89_vm0, %v46_v22  ;;  %v483_v5 = vld [vmem:[%s1263_s1 + $0x20] sm:$0xff]  ;;  %v485_v19 = vld [vmem:[%s1263_s1 + $0x30] sm:$0xff] }
  0x20   :  { %153 = vmatpush.msra.mxu0 %v71_v20 }
  0x21   :  { %154 = vmatmul.f32.vlgmr.msra.gmra.mxu0 %v39_v21 }
  0x23   :  { %749 = vmatmul.msk.f32.gmra.mxu3 %vm496_vm1, %v480_v54 }
  0x26   :  { %720 = vmatmul.msk.f32.gmra.mxu1 %vm89_vm0, %v48_v24 }
  0x29   :  { %157 = vmatmul.f32.gmra.mxu0 %v41_v23 }
  0x2b   :  { %750 = vmatmul.msk.f32.gmra.mxu3 %vm496_vm1, %v481_v57 }
  0x2e   :  { %721 = vmatmul.msk.f32.gmra.mxu1 %vm89_vm0, %v50_v26  ;;  %v486_v26 = vld [vmem:[%s1263_s1 + $0x38] sm:$0xff] }
  0x31   :  { %160 = vmatmul.f32.gmra.mxu0 %v43_v25 }
  0x33   :  { %751 = vmatmul.msk.f32.gmra.mxu3 %vm496_vm1, %v482_v61  ;;  %v491_v61 = vld [vmem:[%s1263_s1 + $0x60] sm:$0xff] }
  0x36   :  { %722 = vmatmul.msk.f32.gmra.mxu1 %vm89_vm0, %v52_v28 }
  0x39   :  { %163 = vmatmul.f32.gmra.mxu0 %v45_v27 }
  0x3b   :  { %752 = vmatmul.msk.f32.gmra.mxu3 %vm496_vm1, %v483_v5  ;;  %v492_v5 = vld [vmem:[%s1263_s1 + $0x68] sm:$0xff] }
  0x3e   :  { %723 = vmatmul.msk.f32.gmra.mxu1 %vm89_vm0, %v54_v30 }
  0x41   :  { %166 = vmatmul.f32.gmra.mxu0 %v47_v29 }
  0x43   :  { %753 = vmatmul.msk.f32.gmra.mxu3 %vm496_vm1, %v484_v12  ;;  %v493_v12 = vld [vmem:[%s1263_s1 + $0x70] sm:$0xff] }
  0x46   :  { %724 = vmatmul.msk.f32.gmra.mxu1 %vm89_vm0, %v56_v32 }
  0x49   :  { %169 = vmatmul.f32.gmra.mxu0 %v49_v31 }
  0x4b   :  { %754 = vmatmul.msk.f32.gmra.mxu3 %vm496_vm1, %v485_v19 }
  0x4e   :  { %725 = vmatmul.msk.f32.gmra.mxu1 %vm89_vm0, %v58_v34 }
  0x51   :  { %172 = vmatmul.f32.gmra.mxu0 %v51_v33  ;;  %v487_v33 = vld [vmem:[%s1263_s1 + $0x40] sm:$0xff] }
  0x53   :  { %755 = vmatmul.msk.f32.gmra.mxu3 %vm496_vm1, %v486_v26 }
  0x56   :  { %726 = vmatmul.msk.f32.gmra.mxu1 %vm89_vm0, %v60_v36 }
  0x59   :  { %175 = vmatmul.f32.gmra.mxu0 %v53_v35 }
  0x5b   :  { %756 = vmatmul.msk.f32.gmra.mxu3 %vm496_vm1, %v487_v33 }
  0x5e   :  { %727 = vmatmul.msk.f32.gmra.mxu1 %vm89_vm0, %v62_v38 }
  0x61   :  { %178 = vmatmul.f32.gmra.mxu0 %v55_v37 }
  0x66   :  { %728 = vmatmul.msk.f32.gmra.mxu1 %vm89_vm0, %v64_v40  ;;  %v488_v40 = vld [vmem:[%s1263_s1 + $0x48] sm:$0xff] }
  0x67   :  { %757 = vmatmul.msk.f32.gmra.mxu3 %vm496_vm1, %v488_v40 }
  0x69   :  { %181 = vmatmul.f32.gmra.mxu0 %v57_v39 }
  0x6e   :  { %729 = vmatmul.msk.f32.gmra.mxu1 %vm89_vm0, %v66_v42 }
  0x71   :  { %184 = vmatmul.f32.gmra.mxu0 %v59_v41 }
  0x76   :  { %730 = vmatmul.msk.f32.gmra.mxu1 %vm89_vm0, %v68_v44 }
  0x79   :  { %187 = vmatmul.f32.gmra.mxu0 %v61_v43 }
  0x7e   :  { %731 = vmatmul.msk.f32.gmra.mxu1 %vm89_vm0, %v70_v46  ;;  %v489_v46 = vld [vmem:[%s1263_s1 + $0x50] sm:$0xff] }
  0x7f   :  { %758 = vmatmul.msk.f32.gmra.mxu3 %vm496_vm1, %v489_v46  ;;  %v1167_v46 = vld [vmem:[%s1268_s6] ss:$0 sm:$0xff]  ;;  %s799_s6 = smov [#allocation2]  }
  0x81   :  { %190 = vmatmul.f32.gmra.mxu0 %v63_v45 }
  0x83   :  { %v220_v52 = vpop.f32.mrf.mxu1 }
  0x89   :  { %193 = vmatmul.f32.gmra.mxu0 %v65_v50 }
  0x8b   :  { %v223_v55 = vpop.f32.mrf.mxu1 }
  0x91   :  { %196 = vmatmul.f32.gmra.mxu0 %v67_v53  ;;  %v490_v53 = vld [vmem:[%s1263_s1 + $0x58] sm:$0xff] }
  0x92   :  { %759 = vmatmul.msk.f32.gmra.mxu3 %vm496_vm1, %v490_v53 }
  0x93   :  { %v226_v58 = vpop.f32.mrf.mxu1 }
  0x99   :  { %199 = vmatmul.f32.gmra.mxu0 %v69_v56 }
  0x9a   :  { %760 = vmatmul.msk.f32.gmra.mxu3 %vm496_vm1, %v491_v61 }
  0x9b   :  { %v229_v0 = vpop.f32.mrf.mxu1 }
  0x9e   :  { %v155_v60 = vpop.f32.mrf.mxu0 }
  0x9f   :  { %v221_v62 = vadd.f32 %v220_v52, %v155_v60 }
  0xa1   :  { %v272_v1 = vmul.f32 %v1052_v59, %v221_v62 }
  0xa2   :  { %761 = vmatmul.msk.f32.gmra.mxu3 %vm496_vm1, %v492_v5 }
  0xa3   :  { %v292_v2 = vadd.f32 %v1060_v63, %v272_v1  ;;  %v232_v7 = vpop.f32.mrf.mxu1 }
  0xa5   :  { %v308_v3 = vmax.f32 %v292_v2, 0.0 }
  0xa6   :  { %v158_v4 = vpop.f32.mrf.mxu0 }
  0xa7   :  { %v224_v6 = vadd.f32 %v223_v55, %v158_v4  ;;  %732 = vmatmul.msk.f32.vlgmr.msra.gmra.mxu2 %vm89_vm0, %v308_v3 }
  0xa9   :  { %v273_v8 = vmul.f32 %v1052_v59, %v224_v6 }
  0xaa   :  { %762 = vmatmul.msk.f32.gmra.mxu3 %vm496_vm1, %v493_v12 }
  0xab   :  { %v293_v9 = vadd.f32 %v1060_v63, %v273_v8  ;;  %v235_v14 = vpop.f32.mrf.mxu1 }
  0xad   :  { %v309_v10 = vmax.f32 %v293_v9, 0.0 }
  0xae   :  { %v161_v11 = vpop.f32.mrf.mxu0 }
  0xaf   :  { %v227_v13 = vadd.f32 %v226_v58, %v161_v11  ;;  %733 = vmatmul.msk.f32.gmra.mxu2 %vm89_vm0, %v309_v10 }
  0xb1   :  { %v274_v15 = vmul.f32 %v1052_v59, %v227_v13 }
  0xb3   :  { %v294_v16 = vadd.f32 %v1060_v63, %v274_v15  ;;  %v238_v22 = vpop.f32.mrf.mxu1 }
  0xb5   :  { %v310_v17 = vmax.f32 %v294_v16, 0.0 }
  0xb6   :  { %v164_v18 = vpop.f32.mrf.mxu0 }
  0xb7   :  { %v230_v20 = vadd.f32 %v229_v0, %v164_v18  ;;  %734 = vmatmul.msk.f32.gmra.mxu2 %vm89_vm0, %v310_v17  ;;  %v494_v18 = vld [vmem:[%s1263_s1 + $0x78] sm:$0xff] }
  0xb8   :  { %763 = vmatmul.msk.f32.gmra.mxu3 %vm496_vm1, %v494_v18 }
  0xb9   :  { %v275_v21 = vmul.f32 %v1052_v59, %v230_v20 }
  0xbb   :  { %v295_v23 = vadd.f32 %v1060_v63, %v275_v21  ;;  %v241_v30 = vpop.f32.mrf.mxu1 }
  0xbd   :  { %v311_v24 = vmax.f32 %v295_v23, 0.0 }
  0xbe   :  { %v167_v25 = vpop.f32.mrf.mxu0 }
  0xbf   :  { %v233_v27 = vadd.f32 %v232_v7, %v167_v25  ;;  %735 = vmatmul.msk.f32.gmra.mxu2 %vm89_vm0, %v311_v24 }
  0xc1   :  { %v276_v28 = vmul.f32 %v1052_v59, %v233_v27 }
  0xc3   :  { %v296_v29 = vadd.f32 %v1060_v63, %v276_v28  ;;  %v244_v39 = vpop.f32.mrf.mxu1  ;;  %v562_v28 = vpop.f32.mrf.mxu3 }
  0xc5   :  { %v312_v31 = vmax.f32 %v296_v29, 0.0 }
  0xc6   :  { %v170_v32 = vpop.f32.mrf.mxu0 }
  0xc7   :  { %v236_v34 = vadd.f32 %v235_v14, %v170_v32  ;;  %736 = vmatmul.msk.f32.gmra.mxu2 %vm89_vm0, %v312_v31 }
  0xc9   :  { %v277_v35 = vmul.f32 %v1052_v59, %v236_v34 }
  0xcb   :  { %v297_v36 = vadd.f32 %v1060_v63, %v277_v35  ;;  %v247_v48 = vpop.f32.mrf.mxu1  ;;  %v565_v34 = vpop.f32.mrf.mxu3 }
  0xcd   :  { %v313_v37 = vmax.f32 %v297_v36, 0.0 }
  0xce   :  { %v173_v38 = vpop.f32.mrf.mxu0 }
  0xcf   :  { %v239_v41 = vadd.f32 %v238_v22, %v173_v38  ;;  %737 = vmatmul.msk.f32.gmra.mxu2 %vm89_vm0, %v313_v37 }
  0xd1   :  { %v278_v42 = vmul.f32 %v1052_v59, %v239_v41 }
  0xd3   :  { %v298_v43 = vadd.f32 %v1060_v63, %v278_v42  ;;  %v250_v56 = vpop.f32.mrf.mxu1  ;;  %v568_v41 = vpop.f32.mrf.mxu3 }
  0xd5   :  { %v314_v44 = vmax.f32 %v298_v43, 0.0 }
  0xd6   :  { %v176_v45 = vpop.f32.mrf.mxu0 }
  0xd7   :  { %v242_v47 = vadd.f32 %v241_v30, %v176_v45  ;;  %738 = vmatmul.msk.f32.gmra.mxu2 %vm89_vm0, %v314_v44  ;;  %v1162_v44 = vld [vmem:[%s1271_s9] ss:$0 sm:$0xff] }
  0xd9   :  { %v279_v49 = vmul.f32 %v1052_v59, %v242_v47  ;;  %v614_v47 = vmul.f32 %v1162_v44, %v562_v28 }
  0xdb   :  { %v299_v50 = vadd.f32 %v1060_v63, %v279_v49  ;;  %v253_v2 = vpop.f32.mrf.mxu1  ;;  %v571_v45 = vpop.f32.mrf.mxu3 }
  0xdd   :  { %v315_v51 = vmax.f32 %v299_v50, 0.0 }
  0xde   :  { %v179_v52 = vpop.f32.mrf.mxu0 }
  0xdf   :  { %v245_v54 = vadd.f32 %v244_v39, %v179_v52  ;;  %739 = vmatmul.msk.f32.gmra.mxu2 %vm89_vm0, %v315_v51 }
  0xe1   :  { %v280_v55 = vmul.f32 %v1052_v59, %v245_v54  ;;  %v615_v54 = vmul.f32 %v1162_v44, %v565_v34 }
  0xe3   :  { %v300_v57 = vadd.f32 %v1060_v63, %v280_v55  ;;  %v256_v11 = vpop.f32.mrf.mxu1  ;;  %v574_v52 = vpop.f32.mrf.mxu3 }
  0xe5   :  { %v316_v58 = vmax.f32 %v300_v57, 0.0 }
  0xe6   :  { %v182_v60 = vpop.f32.mrf.mxu0 }
  0xe7   :  { %v248_v62 = vadd.f32 %v247_v48, %v182_v60  ;;  %740 = vmatmul.msk.f32.gmra.mxu2 %vm89_vm0, %v316_v58 }
  0xe9   :  { %v281_v0 = vmul.f32 %v1052_v59, %v248_v62  ;;  %v616_v62 = vmul.f32 %v1162_v44, %v568_v41 }
  0xeb   :  { %v301_v1 = vadd.f32 %v1060_v63, %v281_v0  ;;  %v259_v20 = vpop.f32.mrf.mxu1  ;;  %v577_v0 = vpop.f32.mrf.mxu3 }
  0xed   :  { %v317_v3 = vmax.f32 %v301_v1, 0.0 }
  0xee   :  { %v185_v4 = vpop.f32.mrf.mxu0 }
  0xef   :  { %v251_v6 = vadd.f32 %v250_v56, %v185_v4  ;;  %741 = vmatmul.msk.f32.gmra.mxu2 %vm89_vm0, %v317_v3 }
  0xf1   :  { %v282_v7 = vmul.f32 %v1052_v59, %v251_v6 }
  0xf3   :  { %v302_v8 = vadd.f32 %v1060_v63, %v282_v7  ;;  %v262_v27 = vpop.f32.mrf.mxu1  ;;  %v617_v7 = vmul.f32 %v1162_v44, %v571_v45 }
  0xf5   :  { %v318_v9 = vmax.f32 %v302_v8, 0.0 }
  0xf6   :  { %v188_v10 = vpop.f32.mrf.mxu0 }
  0xf7   :  { %v254_v13 = vadd.f32 %v253_v2, %v188_v10  ;;  %742 = vmatmul.msk.f32.gmra.mxu2 %vm89_vm0, %v318_v9  ;;  %v580_v10 = vpop.f32.mrf.mxu3 }
  0xf9   :  { %v283_v14 = vmul.f32 %v1052_v59, %v254_v13 }
  0xfb   :  { %v303_v15 = vadd.f32 %v1060_v63, %v283_v14  ;;  %v265_v36 = vpop.f32.mrf.mxu1 }
  0xfd   :  { %v319_v16 = vmax.f32 %v303_v15, 0.0  ;;  %v618_v15 = vmul.f32 %v1162_v44, %v574_v52 }
  0xfe   :  { %v191_v17 = vpop.f32.mrf.mxu0 }
  0xff   :  { %v257_v19 = vadd.f32 %v256_v11, %v191_v17  ;;  %743 = vmatmul.msk.f32.gmra.mxu2 %vm89_vm0, %v319_v16 }
 0x101   :  { %v284_v21 = vmul.f32 %v1052_v59, %v257_v19 }
 0x103   :  { %v304_v22 = vadd.f32 %v1060_v63, %v284_v21 }
 0x105   :  { %v320_v23 = vmax.f32 %v304_v22, 0.0 }
 0x106   :  { %v194_v24 = vpop.f32.mrf.mxu0 }
 0x107   :  { %v260_v25 = vadd.f32 %v259_v20, %v194_v24  ;;  %744 = vmatmul.msk.f32.gmra.mxu2 %vm89_vm0, %v320_v23  ;;  %v583_v20 = vpop.f32.mrf.mxu3  ;;  %v619_v23 = vmul.f32 %v1162_v44, %v577_v0 }
 0x109   :  { %v285_v26 = vmul.f32 %v1052_v59, %v260_v25 }
 0x10b   :  { %v305_v29 = vadd.f32 %v1060_v63, %v285_v26 }
 0x10d   :  { %v321_v30 = vmax.f32 %v305_v29, 0.0 }
 0x10e   :  { %v197_v31 = vpop.f32.mrf.mxu0 }
 0x10f   :  { %v263_v32 = vadd.f32 %v262_v27, %v197_v31  ;;  %745 = vmatmul.msk.f32.gmra.mxu2 %vm89_vm0, %v321_v30  ;;  %v586_v29 = vpop.f32.mrf.mxu3  ;;  %v620_v31 = vmul.f32 %v1162_v44, %v580_v10 }
 0x111   :  { %v286_v33 = vmul.f32 %v1052_v59, %v263_v32 }
 0x113   :  { %v306_v35 = vadd.f32 %v1060_v63, %v286_v33 }
 0x115   :  { %v322_v37 = vmax.f32 %v306_v35, 0.0 }
 0x116   :  { %v200_v38 = vpop.f32.mrf.mxu0 }
 0x117   :  { %v266_v39 = vadd.f32 %v265_v36, %v200_v38  ;;  %746 = vmatmul.msk.f32.gmra.mxu2 %vm89_vm0, %v322_v37  ;;  %v621_v38 = vmul.f32 %v1162_v44, %v583_v20 }
 0x119   :  { %v287_v40 = vmul.f32 %v1052_v59, %v266_v39  ;;  %v1173_v59 = vld [vmem:[%s1272_s10] ss:$0 sm:$0xff]  ;;  %v589_v39 = vpop.f32.mrf.mxu3 }
 0x11a   :  { %v634_v50 = vadd.f32 %v1173_v59, %v614_v47  ;;  %v635_v58 = vadd.f32 %v1173_v59, %v615_v54  ;;  %v636_v4 = vadd.f32 %v1173_v59, %v616_v62  ;;  %v637_v12 = vadd.f32 %v1173_v59, %v617_v7 }
 0x11b   :  { %v307_v42 = vadd.f32 %v1060_v63, %v287_v40  ;;  %v1178_v63 = vld [vmem:[%s1269_s7] ss:$0 sm:$0xff]  ;;  %v638_v19 = vadd.f32 %v1173_v59, %v618_v15  ;;  %v639_v27 = vadd.f32 %v1173_v59, %v619_v23  ;;  %v640_v35 = vadd.f32 %v1173_v59, %v620_v31  ;;  %s702_s7 = sshll.u32 %s799_s6, 4  ;;  %s703_s7 = int_to_ptr.vmem [resolvable:$true] %s702_s7 }
 0x11d   :  { %v323_v43 = vmax.f32 %v307_v42, 0.0 }
 0x11f   :  { %747 = vmatmul.msk.f32.gmra.mxu2 %vm89_vm0, %v323_v43  ;;  %v641_v43 = vadd.f32 %v1173_v59, %v621_v38 }
 0x12a   :  { %v391_v48 = vpop.f32.mrf.mxu2 }
 0x12b   :  { %v443_v49 = vmul.f32 %v1167_v46, %v391_v48  ;;  %v622_v48 = vmul.f32 %v1162_v44, %v586_v29 }
 0x12d   :  { %v463_v51 = vadd.f32 %v1178_v63, %v443_v49 }
 0x12f   :  { %v650_v53 = vadd.f32 %v634_v50, %v463_v51  ;;  %v592_v51 = vpop.f32.mrf.mxu3 }
 0x131   :  { %v666_v55 = vmax.f32 %v650_v53, 0.0  ;;  %v642_v53 = vadd.f32 %v1173_v59, %v622_v48 }
 0x132   :  { %v394_v56 = vpop.f32.mrf.mxu2 }
 0x133   :  { %682 = vst.msk [vmem:[#allocation2] sm:$0xff] %vm89_vm0, %v666_v55  ;;  %v444_v57 = vmul.f32 %v1167_v46, %v394_v56  ;;  %v623_v56 = vmul.f32 %v1162_v44, %v589_v39 }
 0x135   :  { %v464_v60 = vadd.f32 %v1178_v63, %v444_v57 }
 0x137   :  { %v651_v61 = vadd.f32 %v635_v58, %v464_v60  ;;  %v595_v62 = vpop.f32.mrf.mxu3 }
 0x138   :  { %v625_v10 = vmul.f32 %v1162_v44, %v595_v62 }
 0x139   :  { %v667_v1 = vmax.f32 %v651_v61, 0.0  ;;  %v643_v61 = vadd.f32 %v1173_v59, %v623_v56 }
 0x13a   :  { %v397_v2 = vpop.f32.mrf.mxu2 }
 0x13b   :  { %683 = vst.msk [vmem:[#allocation2 + $0x8] sm:$0xff] %vm89_vm0, %v667_v1  ;;  %v445_v3 = vmul.f32 %v1167_v46, %v397_v2  ;;  %v624_v2 = vmul.f32 %v1162_v44, %v592_v51 }
 0x13d   :  { %v465_v5 = vadd.f32 %v1178_v63, %v445_v3 }
 0x13f   :  { %v652_v6 = vadd.f32 %v636_v4, %v465_v5 }
 0x141   :  { %v668_v8 = vmax.f32 %v652_v6, 0.0  ;;  %v644_v6 = vadd.f32 %v1173_v59, %v624_v2 }
 0x142   :  { %v400_v9 = vpop.f32.mrf.mxu2 }
 0x143   :  { %684 = vst.msk [vmem:[#allocation2 + $0x10] sm:$0xff] %vm89_vm0, %v668_v8  ;;  %v446_v11 = vmul.f32 %v1167_v46, %v400_v9  ;;  %v598_v8 = vpop.f32.mrf.mxu3 }
 0x145   :  { %v466_v13 = vadd.f32 %v1178_v63, %v446_v11 }
 0x147   :  { %v653_v14 = vadd.f32 %v637_v12, %v466_v13 }
 0x149   :  { %v669_v16 = vmax.f32 %v653_v14, 0.0  ;;  %v645_v14 = vadd.f32 %v1173_v59, %v625_v10 }
 0x14a   :  { %v403_v17 = vpop.f32.mrf.mxu2 }
 0x14b   :  { %685 = vst.msk [vmem:[#allocation2 + $0x18] sm:$0xff] %vm89_vm0, %v669_v16  ;;  %v447_v18 = vmul.f32 %v1167_v46, %v403_v17  ;;  %v626_v17 = vmul.f32 %v1162_v44, %v598_v8 }
 0x14d   :  { %v467_v21 = vadd.f32 %v1178_v63, %v447_v18  ;;  %v601_v18 = vpop.f32.mrf.mxu3 }
 0x14f   :  { %v654_v22 = vadd.f32 %v638_v19, %v467_v21 }
 0x151   :  { %v670_v24 = vmax.f32 %v654_v22, 0.0  ;;  %v646_v22 = vadd.f32 %v1173_v59, %v626_v17 }
 0x152   :  { %v406_v25 = vpop.f32.mrf.mxu2 }
 0x153   :  { %686 = vst.msk [vmem:[#allocation2 + $0x20] sm:$0xff] %vm89_vm0, %v670_v24  ;;  %v448_v26 = vmul.f32 %v1167_v46, %v406_v25  ;;  %v627_v25 = vmul.f32 %v1162_v44, %v601_v18 }
 0x155   :  { %v468_v28 = vadd.f32 %v1178_v63, %v448_v26 }
 0x157   :  { %v655_v30 = vadd.f32 %v639_v27, %v468_v28  ;;  %v604_v28 = vpop.f32.mrf.mxu3 }
 0x159   :  { %v671_v32 = vmax.f32 %v655_v30, 0.0  ;;  %v647_v30 = vadd.f32 %v1173_v59, %v627_v25 }
 0x15a   :  { %v409_v33 = vpop.f32.mrf.mxu2 }
 0x15b   :  { %687 = vst.msk [vmem:[#allocation2 + $0x28] sm:$0xff] %vm89_vm0, %v671_v32  ;;  %v449_v34 = vmul.f32 %v1167_v46, %v409_v33  ;;  %v628_v33 = vmul.f32 %v1162_v44, %v604_v28 }
 0x15d   :  { %v469_v36 = vadd.f32 %v1178_v63, %v449_v34 }
 0x15f   :  { %v656_v37 = vadd.f32 %v640_v35, %v469_v36  ;;  %v607_v38 = vpop.f32.mrf.mxu3 }
 0x161   :  { %v672_v40 = vmax.f32 %v656_v37, 0.0  ;;  %v648_v37 = vadd.f32 %v1173_v59, %v628_v33 }
 0x162   :  { %v412_v41 = vpop.f32.mrf.mxu2 }
 0x163   :  { %688 = vst.msk [vmem:[#allocation2 + $0x30] sm:$0xff] %vm89_vm0, %v672_v40  ;;  %v450_v42 = vmul.f32 %v1167_v46, %v412_v41  ;;  %v629_v41 = vmul.f32 %v1162_v44, %v607_v38 }
 0x165   :  { %v470_v45 = vadd.f32 %v1178_v63, %v450_v42 }
 0x167   :  { %v657_v47 = vadd.f32 %v641_v43, %v470_v45 }
 0x169   :  { %v673_v49 = vmax.f32 %v657_v47, 0.0  ;;  %v649_v47 = vadd.f32 %v1173_v59, %v629_v41 }
 0x16a   :  { %v415_v50 = vpop.f32.mrf.mxu2 }
 0x16b   :  { %689 = vst.msk [vmem:[#allocation2 + $0x38] sm:$0xff] %vm89_vm0, %v673_v49  ;;  %v451_v52 = vmul.f32 %v1167_v46, %v415_v50 }
 0x16d   :  { %v471_v54 = vadd.f32 %v1178_v63, %v451_v52 }
 0x16f   :  { %v658_v55 = vadd.f32 %v642_v53, %v471_v54 }
 0x171   :  { %v674_v57 = vmax.f32 %v658_v55, 0.0 }
 0x172   :  { %v418_v58 = vpop.f32.mrf.mxu2 }
 0x173   :  { %690 = vst.msk [vmem:[#allocation2 + $0x40] sm:$0xff] %vm89_vm0, %v674_v57  ;;  %v452_v60 = vmul.f32 %v1167_v46, %v418_v58 }
 0x175   :  { %v472_v0 = vadd.f32 %v1178_v63, %v452_v60 }
 0x177   :  { %v659_v1 = vadd.f32 %v643_v61, %v472_v0 }
 0x179   :  { %v675_v3 = vmax.f32 %v659_v1, 0.0 }
 0x17a   :  { %v421_v4 = vpop.f32.mrf.mxu2 }
 0x17b   :  { %691 = vst.msk [vmem:[#allocation2 + $0x48] sm:$0xff] %vm89_vm0, %v675_v3  ;;  %v453_v5 = vmul.f32 %v1167_v46, %v421_v4 }
 0x17d   :  { %v473_v7 = vadd.f32 %v1178_v63, %v453_v5 }
 0x17f   :  { %v660_v9 = vadd.f32 %v644_v6, %v473_v7 }
 0x181   :  { %v676_v11 = vmax.f32 %v660_v9, 0.0 }
 0x182   :  { %v424_v12 = vpop.f32.mrf.mxu2 }
 0x183   :  { %692 = vst.msk [vmem:[#allocation2 + $0x50] sm:$0xff] %vm89_vm0, %v676_v11  ;;  %v454_v13 = vmul.f32 %v1167_v46, %v424_v12 }
 0x185   :  { %v474_v15 = vadd.f32 %v1178_v63, %v454_v13 }
 0x187   :  { %v661_v16 = vadd.f32 %v645_v14, %v474_v15 }
 0x189   :  { %v677_v19 = vmax.f32 %v661_v16, 0.0 }
 0x18a   :  { %v427_v20 = vpop.f32.mrf.mxu2 }
 0x18b   :  { %693 = vst.msk [vmem:[#allocation2 + $0x58] sm:$0xff] %vm89_vm0, %v677_v19  ;;  %v455_v21 = vmul.f32 %v1167_v46, %v427_v20 }
 0x18d   :  { %v475_v23 = vadd.f32 %v1178_v63, %v455_v21 }
 0x18f   :  { %v662_v24 = vadd.f32 %v646_v22, %v475_v23 }
 0x191   :  { %v678_v26 = vmax.f32 %v662_v24, 0.0 }
 0x192   :  { %v430_v27 = vpop.f32.mrf.mxu2 }
 0x193   :  { %694 = vst.msk [vmem:[#allocation2 + $0x60] sm:$0xff] %vm89_vm0, %v678_v26  ;;  %v456_v29 = vmul.f32 %v1167_v46, %v430_v27 }
 0x195   :  { %v476_v31 = vadd.f32 %v1178_v63, %v456_v29 }
 0x197   :  { %v663_v32 = vadd.f32 %v647_v30, %v476_v31 }
 0x199   :  { %v679_v34 = vmax.f32 %v663_v32, 0.0 }
 0x19a   :  { %v433_v35 = vpop.f32.mrf.mxu2 }
 0x19b   :  { %695 = vst.msk [vmem:[#allocation2 + $0x68] sm:$0xff] %vm89_vm0, %v679_v34  ;;  %v457_v36 = vmul.f32 %v1167_v46, %v433_v35 }
 0x19d   :  { %v477_v39 = vadd.f32 %v1178_v63, %v457_v36 }
 0x19f   :  { %v664_v40 = vadd.f32 %v648_v37, %v477_v39 }
 0x1a1   :  { %v680_v42 = vmax.f32 %v664_v40, 0.0 }
 0x1a2   :  { %v436_v43 = vpop.f32.mrf.mxu2 }
 0x1a3   :  { %696 = vst.msk [vmem:[#allocation2 + $0x70] sm:$0xff] %vm89_vm0, %v680_v42  ;;  %v458_v45 = vmul.f32 %v1167_v46, %v436_v43 }
 0x1a5   :  { %v478_v48 = vadd.f32 %v1178_v63, %v458_v45 }
 0x1a7   :  { %v665_v49 = vadd.f32 %v649_v47, %v478_v48 }
 0x1a9   :  { %v681_v44 = vmax.f32 %v665_v49, 0.0 }
 0x1ab   :  { %697 = vst.msk [vmem:[#allocation2 + $0x78] sm:$0xff] %vm89_vm0, %v681_v44 }
 0x1ac   :  { %710 = dma.vmem_to_hbm [thread:$0]  %s703_s7, 2048, %s705_s18, [#allocation3], %s800_s19, %s800_s19, %s801_s20  }
 0x1ad   :  { %797 = dma.done.wait [#allocation3], 2048  }
 0x1ae   :  { %798 = vsyncadd [#allocation3], 4294965248 }
 0x1af   :  { %715 = vsyncpa [#allocation3], 1 }

</bundles_post_ra>
